<compile_context>
chip_gen: v7x
topology: tpu7x:2x2x1
jax: 0.10.0
libtpu: 0.0.40
codegen_flags: <defaults>
</compile_context>

<pallas_src>
import functools

import jax
import jax.numpy as jnp
from jax.experimental import pallas as pl
from jax.experimental.pallas import tpu as pltpu


def _cdiv(a, b):
    return (a + b - 1) // b


def _round_up(a, b):
    return _cdiv(a, b) * b


def _detect_num_cores():
    """2 on v7x (two TensorCores per chip that the 'parallel' grid axis can
    shard across); 1 on v5e/v6e where a size-2 axis is just a serial loop."""
    try:
        kind = jax.devices()[0].device_kind.lower()
    except Exception:
        return 1
    return 2 if "v7" in kind else 1


def _vmem_limit_bytes():
    """Generation-aware scoped-VMEM limit: half of physical, capped at 64 MiB
    (v7x only has 64 MiB/TC vs 128 MiB on v5e/v6e)."""
    cap = None
    try:
        cap = int(pltpu.get_tpu_info().vmem_capacity_bytes)
    except Exception:
        cap = None
    if cap is None or cap <= 0:
        try:
            kind = jax.devices()[0].device_kind.lower()
        except Exception:
            kind = ""
        cap = (128 << 20) if ("v5" in kind or "v6" in kind) else (64 << 20)
    return int(min(cap // 2, 64 << 20))


def _choose_tile(N, C, itemsize, num_cores, tile_n, vmem_limit):
    """Pick the batch tile (rows per block) from a per-row VMEM footprint."""
    row_align = 8 if itemsize >= 4 else (16 if itemsize == 2 else 32)
    per_core = _cdiv(N, num_cores)
    if tile_n is not None:
        cap = _round_up(max(int(tile_n), row_align), row_align)
    else:
        # Estimated live VMEM bytes per batch row while the pipeline runs:
        #  * logits block in native dtype, double-buffered
        #  * (tn,1) targets + alpha blocks (lane-padded to 4 KiB tiles ->
        #    64 B/row each), double-buffered
        #  * ~4 live f32 (tn, C) temporaries (upcast, exp, select, slack)
        #  * (tn,1) f32 accumulator scratch + spilled (tn,1) temporaries
        bytes_per_row = (2 * C * itemsize) + (2 * 2 * 64) + (4 * C * 4) + (6 * 64)
        budget = int(vmem_limit * 0.6)
        cap = min(4096, budget // max(bytes_per_row, 1))
        cap = max(row_align, (cap // row_align) * row_align)
    tn = min(cap, _round_up(per_core, row_align))
    tiles_per_core = _cdiv(per_core, tn)
    return tn, tiles_per_core


def _logits_block_spec(block_shape, index_map, buffer_count):
    # Optional deeper input pipelining (v7x tuning knob: sweep 2 vs 3 when the
    # logits block stays <= ~1 MiB). Default None keeps double buffering.
    if buffer_count is not None and int(buffer_count) != 2:
        try:
            return pl.BlockSpec(block_shape, index_map,
                                pipeline_mode=pl.Buffered(int(buffer_count)))
        except Exception:
            pass  # fall back to default double buffering
    return pl.BlockSpec(block_shape, index_map)


def _focal_loss_kernel(logits_ref, targets_ref, alpha_sel_ref, out_ref, acc_ref,
                       *, gamma, n_valid, tiles_per_core, num_blocks):
    # grid = (num_cores, tiles_per_core); axis 0 "parallel", axis 1 "arbitrary"
    c = pl.program_id(0)
    i = pl.program_id(1)

    @pl.when(i == 0)
    def _init():
        acc_ref[...] = jnp.zeros_like(acc_ref)

    x = logits_ref[...].astype(jnp.float32)      # (tn, C) — true, unpadded C
    t = targets_ref[...]                         # (tn, 1) int32
    a_sel = alpha_sel_ref[...]                   # (tn, 1) f32, alpha[target]
    tn, cc = x.shape

    # One-hot hit mask of the target class (bool; no f32 mask multiply).
    class_ids = jax.lax.broadcasted_iota(jnp.int32, (tn, cc), 1)
    hit = class_ids == t                         # (tn, C)

    # Log-softmax via log-sum-exp (numerically safe). Axis-1 reductions over
    # the unpadded C are masked by Mosaic for the partial lane tile.
    m = jnp.max(x, axis=1, keepdims=True)
    lse = m + jnp.log(jnp.sum(jnp.exp(x - m), axis=1, keepdims=True))
    x_t = jnp.sum(jnp.where(hit, x, 0.0), axis=1, keepdims=True)
    log_p = jnp.minimum(x_t - lse, 0.0)          # (tn, 1), <= 0
    probs = jnp.exp(log_p)

    one_minus_p = jnp.maximum(1.0 - probs, 0.0)
    g = float(gamma)
    if g.is_integer() and 0.0 <= g <= 16.0:
        # Small integer exponent -> plain VPU multiplies, exact, NaN-free.
        w = jnp.ones_like(one_minus_p)
        for _ in range(int(g)):
            w = w * one_minus_p
    else:
        w = jnp.power(one_minus_p, jnp.float32(g))

    batch_loss = -a_sel * w * log_p              # (tn, 1)

    # Mask rows outside the real batch (ragged last block / clamped duplicate
    # block on the 2-core split). Select, not multiply: garbage rows in a
    # partial block may contain NaN/Inf.
    gi = c * tiles_per_core + i
    base = jnp.minimum(gi, num_blocks - 1) * tn
    rows = base + jax.lax.broadcasted_iota(jnp.int32, (tn, 1), 0)
    valid = (rows < n_valid) & (gi < num_blocks)

    # Vector accumulate; the cross-sublane reduce happens only at finalize.
    acc_ref[...] = acc_ref[...] + jnp.where(valid, batch_loss, 0.0)

    @pl.when(i == pl.num_programs(1) - 1)
    def _finalize():
        out_ref[...] = jnp.sum(acc_ref[...]).reshape(1, 1, 1)


def focal_loss(logits, targets, alpha=None, gamma=2, size_average=True,
               tile_n=None, num_cores=None, logits_buffers=None):
    """Pallas TPU implementation of FocalLoss.forward.

    logits:  (N, C) float array (f32/bf16/f16 — shipped in native dtype)
    targets: (N,)   int   array of class ids in [0, C)
    alpha:   optional (C,) or (C, 1) per-class scale; defaults to ones
    logits_buffers: optional input-pipeline depth for the logits stream
                    (sweep 2 vs 3 on v7x when blocks are <= ~1 MiB)
    """
    N, C = logits.shape
    if alpha is None:
        alpha_vec = jnp.ones((C,), dtype=jnp.float32)
    else:
        alpha_vec = jnp.asarray(alpha, dtype=jnp.float32).reshape(-1)
    targets_i32 = jnp.asarray(targets, dtype=jnp.int32)

    # Pre-gather alpha[target] outside the kernel: one tiny (N,) gather that
    # deletes the alpha input, its mask multiply and cross-lane reduce.
    alpha_sel = alpha_vec[targets_i32].reshape(N, 1)
    targets2d = targets_i32.reshape(N, 1)

    if num_cores is None:
        num_cores = _detect_num_cores()
    num_cores = max(1, int(num_cores))

    vmem_limit = _vmem_limit_bytes()
    itemsize = jnp.dtype(logits.dtype).itemsize
    tn, tiles_per_core = _choose_tile(N, C, itemsize, num_cores, tile_n,
                                      vmem_limit)
    num_blocks = _cdiv(N, tn)            # valid row-blocks over the real batch
    last_block = num_blocks - 1

    def row_block_map(c, i):
        # Clamp so a core never issues a fully out-of-bounds DMA; duplicate
        # (clamped) blocks are zeroed inside the kernel via the row mask.
        return (jnp.minimum(c * tiles_per_core + i, last_block), 0)

    kernel = functools.partial(_focal_loss_kernel, gamma=gamma, n_valid=N,
                               tiles_per_core=tiles_per_core,
                               num_blocks=num_blocks)

    out = pl.pallas_call(
        kernel,
        out_shape=jax.ShapeDtypeStruct((num_cores, 1, 1), jnp.float32),
        grid_spec=pltpu.PrefetchScalarGridSpec(
            num_scalar_prefetch=0,
            grid=(num_cores, tiles_per_core),
            in_specs=[
                # logits: (tn, C) blocks, native dtype, pipelined over batch
                _logits_block_spec((tn, C), row_block_map, logits_buffers),
                # targets: (tn, 1) int32 blocks
                pl.BlockSpec((tn, 1), row_block_map),
                # alpha[target]: (tn, 1) f32 blocks
                pl.BlockSpec((tn, 1), row_block_map),
            ],
            out_specs=pl.BlockSpec((1, 1, 1), lambda c, i: (c, 0, 0)),
            scratch_shapes=[pltpu.VMEM((tn, 1), jnp.float32)],
        ),
        compiler_params=pltpu.CompilerParams(
            dimension_semantics=("parallel", "arbitrary"),
            vmem_limit_bytes=vmem_limit),
    )(logits, targets2d, alpha_sel)

    total = jnp.sum(out)  # sum the per-core partials
    if size_average:
        return total / jnp.float32(N)
    return total


def _focal_loss_ref(logits, targets, alpha=None, gamma=2, size_average=True):
    """Pure-JAX reference, mirrors the PyTorch forward exactly."""
    N, C = logits.shape
    if alpha is None:
        alpha = jnp.ones((C,), dtype=jnp.float32)
    alpha = jnp.asarray(alpha, dtype=jnp.float32).reshape(-1)
    p = jax.nn.softmax(logits.astype(jnp.float32), axis=1)
    mask = jax.nn.one_hot(targets, C, dtype=jnp.float32)
    probs = jnp.sum(p * mask, axis=1)
    alpha_sel = alpha[targets]
    batch_loss = -alpha_sel * jnp.power(1.0 - probs, gamma) * jnp.log(probs)
    return jnp.mean(batch_loss) if size_average else jnp.sum(batch_loss)


if __name__ == "__main__":
    # class_num = 36 (from the EfficientNet_36classes training script)
    key = jax.random.PRNGKey(0)
    k1, k2, k3, k4 = jax.random.split(key, 4)
    C = 36

    # --- test 1: small batch, f32, mean reduction, autodetected cores ------
    N = 8
    logits = jax.random.normal(k1, (N, C), dtype=jnp.float32)
    targets = jax.random.randint(k2, (N,), 0, C, dtype=jnp.int32)

    loss = focal_loss(logits, targets, gamma=2, size_average=True)
    loss = jax.block_until_ready(loss)
    ref = _focal_loss_ref(logits, targets, gamma=2, size_average=True)
    assert jnp.allclose(loss, ref, rtol=1e-5, atol=1e-5), (loss, ref)

    # --- test 2: ragged batch, forced 2-core split + tiny tiles (exercises
    # --- the clamped duplicate block + row mask), non-uniform alpha, sum ----
    N2 = 50
    logits2 = 3.0 * jax.random.normal(k3, (N2, C), dtype=jnp.float32)
    targets2 = jax.random.randint(k4, (N2,), 0, C, dtype=jnp.int32)
    alpha2 = jnp.linspace(0.5, 1.5, C, dtype=jnp.float32)
    loss2 = focal_loss(logits2, targets2, alpha=alpha2, gamma=2,
                       size_average=False, tile_n=8, num_cores=2)
    loss2 = jax.block_until_ready(loss2)
    ref2 = _focal_loss_ref(logits2, targets2, alpha=alpha2, gamma=2,
                           size_average=False)
    assert jnp.allclose(loss2, ref2, rtol=1e-5, atol=1e-4), (loss2, ref2)

    # --- test 3: bf16 logits shipped natively (16-row alignment path) ------
    logits_bf16 = logits.astype(jnp.bfloat16)
    loss3 = focal_loss(logits_bf16, targets, gamma=2, size_average=True)
    loss3 = jax.block_until_ready(loss3)
    ref3 = _focal_loss_ref(logits_bf16.astype(jnp.float32), targets,
                           gamma=2, size_average=True)
    assert jnp.allclose(loss3, ref3, rtol=2e-2, atol=2e-2), (loss3, ref3)

    print("KERNEL_OK")
</pallas_src>

<mosaic_0001>
module attributes {stable_mosaic.version = 11 : i64} {
  func.func @_focal_loss_kernel(%arg0: i32, %arg1: i32, %arg2: memref<8x36xf32, #tpu.memory_space<vmem>>, %arg3: memref<8x1xi32, #tpu.memory_space<vmem>>, %arg4: memref<8x1xf32, #tpu.memory_space<vmem>>, %arg5: memref<1x1x1xf32, #tpu.memory_space<vmem>>, %arg6: memref<8x1xf32, #tpu.memory_space<vmem>>) attributes {dimension_semantics = [#tpu.dimension_semantics<parallel>, #tpu.dimension_semantics<arbitrary>], iteration_bounds = array<i64: 1, 1>, scalar_prefetch = 0 : i64, scratch_operands = 1 : i64, tpu.core_type = #tpu.core_type<tc>, window_params = [{transform_indices = @transform_0, window_bounds = array<i64: 8, 36>}, {transform_indices = @transform_1, window_bounds = array<i64: 8, 1>}, {transform_indices = @transform_2, window_bounds = array<i64: 8, 1>}, {transform_indices = @transform_3, window_bounds = array<i64: 1, 1, 1>}]} {
    %c0_i32 = arith.constant 0 : i32
    %0 = arith.cmpi eq, %arg1, %c0_i32 : i32
    %1 = arith.extui %0 : i1 to i32
    %c0_i32_0 = arith.constant 0 : i32
    %2 = arith.cmpi ne, %1, %c0_i32_0 : i32
    scf.if %2 {
      %cst_24 = arith.constant 0.000000e+00 : f32
      %57 = vector.broadcast %cst_24 : f32 to vector<8x1xf32>
      %c0_25 = arith.constant 0 : index
      %c0_26 = arith.constant 0 : index
      %58 = vector.load %arg6[%c0_25, %c0_26] : memref<8x1xf32, #tpu.memory_space<vmem>>, vector<8x1xf32>
      tpu.vector_store %arg6[%c0_25, %c0_26], %57 {strides = array<i32>} : memref<8x1xf32, #tpu.memory_space<vmem>>, vector<8x1xf32>,
    } else {
    }
    %c0 = arith.constant 0 : index
    %c0_1 = arith.constant 0 : index
    %3 = vector.load %arg2[%c0, %c0_1] : memref<8x36xf32, #tpu.memory_space<vmem>>, vector<8x36xf32>
    %c0_2 = arith.constant 0 : index
    %c0_3 = arith.constant 0 : index
    %4 = vector.load %arg3[%c0_2, %c0_3] : memref<8x1xi32, #tpu.memory_space<vmem>>, vector<8x1xi32>
    %c0_4 = arith.constant 0 : index
    %c0_5 = arith.constant 0 : index
    %5 = vector.load %arg4[%c0_4, %c0_5] : memref<8x1xf32, #tpu.memory_space<vmem>>, vector<8x1xf32>
    %6 = tpu.iota {dimensions = array<i32: 1>} : vector<8x36xi32>
    %7 = vector.broadcast %4 : vector<8x1xi32> to vector<8x36xi32>
    %8 = arith.cmpi eq, %6, %7 : vector<8x36xi32>
    %cst = arith.constant dense<0xFF800000> : vector<8xf32>
    %9 = vector.multi_reduction <maximumf>, %3, %cst [1] : vector<8x36xf32> to vector<8xf32>
    %10 = vector.shape_cast %9 : vector<8xf32> to vector<8x1xf32>
    %11 = vector.broadcast %10 : vector<8x1xf32> to vector<8x36xf32>
    %12 = arith.subf %3, %11 : vector<8x36xf32>
    %13 = math.exp %12 : vector<8x36xf32>
    %cst_6 = arith.constant dense<0.000000e+00> : vector<8xf32>
    %14 = vector.multi_reduction <add>, %13, %cst_6 [1] : vector<8x36xf32> to vector<8xf32>
    %15 = vector.shape_cast %14 : vector<8xf32> to vector<8x1xf32>
    %16 = math.log %15 : vector<8x1xf32>
    %17 = arith.addf %10, %16 : vector<8x1xf32>
    %cst_7 = arith.constant 0.000000e+00 : f32
    %18 = vector.broadcast %cst_7 : f32 to vector<8x36xf32>
    %19 = arith.select %8, %3, %18 : vector<8x36xi1>, vector<8x36xf32>
    %cst_8 = arith.constant dense<0.000000e+00> : vector<8xf32>
    %20 = vector.multi_reduction <add>, %19, %cst_8 [1] : vector<8x36xf32> to vector<8xf32>
    %21 = vector.shape_cast %20 : vector<8xf32> to vector<8x1xf32>
    %22 = arith.subf %21, %17 : vector<8x1xf32>
    %cst_9 = arith.constant 0.000000e+00 : f32
    %23 = vector.broadcast %cst_9 : f32 to vector<8x1xf32>
    %24 = arith.minimumf %22, %23 : vector<8x1xf32>
    %25 = math.exp %24 : vector<8x1xf32>
    %cst_10 = arith.constant 1.000000e+00 : f32
    %26 = vector.broadcast %cst_10 : f32 to vector<8x1xf32>
    %27 = arith.subf %26, %25 : vector<8x1xf32>
    %cst_11 = arith.constant 0.000000e+00 : f32
    %28 = vector.broadcast %cst_11 : f32 to vector<8x1xf32>
    %29 = arith.maximumf %27, %28 : vector<8x1xf32>
    %cst_12 = arith.constant 1.000000e+00 : f32
    %30 = vector.broadcast %cst_12 : f32 to vector<8x1xf32>
    %31 = arith.mulf %30, %29 : vector<8x1xf32>
    %32 = arith.mulf %31, %29 : vector<8x1xf32>
    %cst_13 = arith.constant 0.000000e+00 : f32
    %33 = vector.broadcast %cst_13 : f32 to vector<8x1xf32>
    %34 = arith.subf %33, %5 : vector<8x1xf32>
    %35 = arith.mulf %34, %32 : vector<8x1xf32>
    %36 = arith.mulf %35, %24 : vector<8x1xf32>
    %c1_i32 = arith.constant 1 : i32
    %37 = arith.muli %arg0, %c1_i32 : i32
    %38 = arith.addi %37, %arg1 : i32
    %c0_i32_14 = arith.constant 0 : i32
    %39 = arith.minsi %38, %c0_i32_14 : i32
    %c8_i32 = arith.constant 8 : i32
    %40 = arith.muli %39, %c8_i32 : i32
    %41 = tpu.iota {dimensions = array<i32: 0>} : vector<8x1xi32>
    %42 = vector.broadcast %40 : i32 to vector<8x1xi32>
    %43 = arith.addi %42, %41 : vector<8x1xi32>
    %c8_i32_15 = arith.constant 8 : i32
    %44 = vector.broadcast %c8_i32_15 : i32 to vector<8x1xi32>
    %45 = arith.cmpi slt, %43, %44 : vector<8x1xi32>
    %c1_i32_16 = arith.constant 1 : i32
    %46 = arith.cmpi slt, %38, %c1_i32_16 : i32
    %47 = vector.broadcast %46 : i1 to vector<8x1xi1>
    %48 = arith.andi %45, %47 : vector<8x1xi1>
    %c0_17 = arith.constant 0 : index
    %c0_18 = arith.constant 0 : index
    %49 = vector.load %arg6[%c0_17, %c0_18] : memref<8x1xf32, #tpu.memory_space<vmem>>, vector<8x1xf32>
    %cst_19 = arith.constant 0.000000e+00 : f32
    %50 = vector.broadcast %cst_19 : f32 to vector<8x1xf32>
    %51 = arith.select %48, %36, %50 : vector<8x1xi1>, vector<8x1xf32>
    %52 = arith.addf %49, %51 : vector<8x1xf32>
    %c0_20 = arith.constant 0 : index
    %c0_21 = arith.constant 0 : index
    %53 = vector.load %arg6[%c0_20, %c0_21] : memref<8x1xf32, #tpu.memory_space<vmem>>, vector<8x1xf32>
    tpu.vector_store %arg6[%c0_20, %c0_21], %52 {strides = array<i32>} : memref<8x1xf32, #tpu.memory_space<vmem>>, vector<8x1xf32>,
    %c0_i32_22 = arith.constant 0 : i32
    %54 = arith.cmpi eq, %arg1, %c0_i32_22 : i32
    %55 = arith.extui %54 : i1 to i32
    %c0_i32_23 = arith.constant 0 : i32
    %56 = arith.cmpi ne, %55, %c0_i32_23 : i32
    scf.if %56 {
      %c0_24 = arith.constant 0 : index
      %c0_25 = arith.constant 0 : index
      %57 = vector.load %arg6[%c0_24, %c0_25] : memref<8x1xf32, #tpu.memory_space<vmem>>, vector<8x1xf32>
      %58 = vector.shape_cast %57 : vector<8x1xf32> to vector<1x8x1xf32>
      %cst_26 = arith.constant dense<0.000000e+00> : vector<1xf32>
      %59 = vector.multi_reduction <add>, %58, %cst_26 [1, 2] : vector<1x8x1xf32> to vector<1xf32>
      %60 = vector.shape_cast %59 : vector<1xf32> to vector<1x1x1xf32>
      %61 = vector.extract %60[0, 0, 0] : f32 from vector<1x1x1xf32>
      %62 = vector.broadcast %61 : f32 to vector<1x1x1xf32>
      %c0_27 = arith.constant 0 : index
      %c0_28 = arith.constant 0 : index
      %c0_29 = arith.constant 0 : index
      %63 = vector.load %arg5[%c0_27, %c0_28, %c0_29] : memref<1x1x1xf32, #tpu.memory_space<vmem>>, vector<1x1x1xf32>
      tpu.vector_store %arg5[%c0_27, %c0_28, %c0_29], %62 {strides = array<i32>} : memref<1x1x1xf32, #tpu.memory_space<vmem>>, vector<1x1x1xf32>,
    } else {
    }
    return
  }
  func.func @transform_0(%arg0: i32, %arg1: i32) -> (i32, i32) {
    %c1_i32 = arith.constant 1 : i32
    %0 = arith.muli %arg0, %c1_i32 : i32
    %1 = arith.addi %0, %arg1 : i32
    %c0_i32 = arith.constant 0 : i32
    %2 = arith.minsi %1, %c0_i32 : i32
    %c0_i32_0 = arith.constant 0 : i32
    %c0_i32_1 = arith.constant 0 : i32
    return %2, %c0_i32_0 : i32, i32
  }
  func.func @transform_1(%arg0: i32, %arg1: i32) -> (i32, i32) {
    %c1_i32 = arith.constant 1 : i32
    %0 = arith.muli %arg0, %c1_i32 : i32
    %1 = arith.addi %0, %arg1 : i32
    %c0_i32 = arith.constant 0 : i32
    %2 = arith.minsi %1, %c0_i32 : i32
    %c0_i32_0 = arith.constant 0 : i32
    %c0_i32_1 = arith.constant 0 : i32
    return %2, %c0_i32_0 : i32, i32
  }
  func.func @transform_2(%arg0: i32, %arg1: i32) -> (i32, i32) {
    %c1_i32 = arith.constant 1 : i32
    %0 = arith.muli %arg0, %c1_i32 : i32
    %1 = arith.addi %0, %arg1 : i32
    %c0_i32 = arith.constant 0 : i32
    %2 = arith.minsi %1, %c0_i32 : i32
    %c0_i32_0 = arith.constant 0 : i32
    %c0_i32_1 = arith.constant 0 : i32
    return %2, %c0_i32_0 : i32, i32
  }
  func.func @transform_3(%arg0: i32, %arg1: i32) -> (i32, i32, i32) {
    %c0_i32 = arith.constant 0 : i32
    %c0_i32_0 = arith.constant 0 : i32
    %c0_i32_1 = arith.constant 0 : i32
    return %arg0, %c0_i32, %c0_i32_0 : i32, i32, i32
  }
}

</mosaic_0001>

<bundles_post_ra>
// kernel: tpu_custom_call.1
= control target key start
LH: loop header
LB: loop body
LE: loop exit
PB: predicated region body
PF: predicated region fallthrough
CT: control target
= control target key end

     0   :  { %vm111_vm0 = vcmask 293888   ;;  %s292_s0 = inlined_call_operand.vmem [shape: f32[8,36], index: 0, kind: input, shape index: {}]   ;;  %s293_s1 = inlined_call_operand.vmem [shape: s32[8,1], index: 1, kind: input, shape index: {}]   ;;  %s294_s2 = inlined_call_operand.vmem [shape: f32[8,1], index: 2, kind: input, shape index: {}]   ;;  %s295_s3 = inlined_call_operand.hbm [shape: f32[1,1,1], index: 3, kind: output, shape index: {}]  }
   0x1   :  { %v102_v0 = vld [vmem:[%s292_s0] sm:$0xff] }
   0x2   :  { %8 = vsyncpa [#allocation4], 0  ;;  %v112_v1 = vsel %vm111_vm0, %v102_v0, -inf  ;;  %v242_v2 = vmov 0   ;;  %v103_v3 = vld [vmem:[%s293_s1] sm:$0xff]  ;;  %v105_v7 = vlaneseq  ;;  %vm100_vm2 = vcmask 7168  }
   0x3   :  { %211 = vset.pattern.permute.xlu0 %v242_v2  ;;  %v243_v14 = vmov 0.0   ;;  %v104_v24 = vld [vmem:[%s294_s2] sm:$0xff]  ;;  %s244_s2 = smov [#allocation3]   ;;  %vm172_vm3 = vcmask 0  }
   0x4   :  { %113 = vmax.xlane.f32.xlu0 %v112_v1  ;;  %v106_v8 = vand.u32 127, %v105_v7  ;;  %101 = vst.msk [vmem:[#allocation2] sm:$0xff] %vm100_vm2, %v243_v14  ;;  %v135_v26 = vsub.f32 0.0, %v104_v24  ;;  %s180_s16 = sshll.u32 %s244_s2, 4  ;;  %s181_s16 = int_to_ptr.vmem [resolvable:$true] %s180_s16 }
   0x5   :  { %s218_s18 = scalar_lea.vmem %s181_s16, 16  ;;  %s222_s19 = scalar_lea.vmem %s181_s16, 32 }
   0x6   :  { %p219_p0 = scmp.ne.s32.totalorder %s181_s16, %s218_s18  ;;  %p223_p1 = scmp.lt.s32.totalorder %s181_s16, %s181_s16 }
   0x7   :  { %p224_p2 = scmp.lt.s32.totalorder %s222_s19, %s218_s18 }
   0x9   :  { %p225_p3 = por %p224_p2, %p223_p1 }
   0xb   :  { %v152_v30 = vld [vmem:[#allocation2] sm:$0xff]  ;;  %p226_p4 = pnand %p225_p3, %p219_p0 }
  0x1a   :  { %108 = vperm.xlu0 %211, %v103_v3  }
  0x91   :  { %v114_v4 = vpop.xlane.xlu0 %113 }
  0x92   :  { %v115_v5 = vsub.f32 %v102_v0, %v114_v4 }
  0x94   :  { %v116_v6 = vmul.f32 1.442695, %v115_v5 }
  0x96   :  { %212 = vpow2.f32 %v116_v6 }
  0x99   :  { %v109_v9 = vpop.permute.xlu0 %108 }
  0x9a   :  { %vm110_vm1 = vcmp.eq.s32.totalorder %v106_v8, %v109_v9 }
  0x9b   :  { %v124_v11 = vsel %vm110_vm1, %v102_v0, 0.0 }
  0x9c   :  { %v125_v13 = vsel %vm111_vm0, %v124_v11, 0.0 }
  0xa0   :  { %v213_v10 = vpop.eup %212 }
  0xa1   :  { %v118_v12 = vsel %vm111_vm0, %v213_v10, 0.0 }
  0xa2   :  { %119 = vadd.xlane.f32.xlu1 %v118_v12 }
  0xa6   :  { %126 = vadd.xlane.f32.xlu1 %v125_v13 }
 0x12f   :  { %v120_v15 = vpop.xlane.xlu1 %119 }
 0x130   :  { %214 = vlog2.f32 %v120_v15 }
 0x133   :  { %v127_v18 = vpop.xlane.xlu1 %126 }
 0x13a   :  { %v215_v16 = vpop.eup %214 }
 0x13b   :  { %v122_v17 = vmul.f32 0.6931472, %v215_v16 }
 0x13d   :  { %v123_v19 = vadd.f32 %v122_v17, %v114_v4 }
 0x13f   :  { %v128_v20 = vsub.f32 %v127_v18, %v123_v19 }
 0x141   :  { %v129_v21 = vmin.f32 %v128_v20, 0.0 }
 0x143   :  { %v130_v22 = vmul.f32 1.442695, %v129_v21 }
 0x145   :  { %216 = vpow2.f32 %v130_v22 }
 0x14f   :  { %v217_v23 = vpop.eup %216 }
 0x150   :  { %v132_v25 = vsub.f32 1.0, %v217_v23 }
 0x152   :  { %v133_v27 = vmax.f32 %v132_v25, 0.0 }
 0x154   :  { %v134_v28 = vmul.f32 %v133_v27, %v133_v27 }
 0x156   :  { %v136_v29 = vmul.f32 %v135_v26, %v134_v28 }
 0x158   :  { %v137_v31 = vmul.f32 %v136_v29, %v129_v21 }
 0x15a   :  { %v154_v32 = vadd.f32 %v152_v30, %v137_v31 }
 0x15c   :  { %156 = vst.msk [vmem:[#allocation2] sm:$0xff] %vm100_vm2, %v154_v32 }
 0x163   :  { %v160_v33 = vld [vmem:[#allocation2] sm:$0xff] }
 0x164   :  { %v161_v34 = vsel %vm100_vm2, %v160_v33, 0.0 }
 0x165   :  { %162 = vadd.xlane.f32.xlu1 %v161_v34 }
 0x1f2   :  { %v163_v35 = vpop.xlane.xlu1 %162 }
 0x1f3   :  { %v164_v36 = vrot.slane %v163_v35, 4 }
 0x1f5   :  { %v165_v37 = vadd.f32 %v164_v36, %v163_v35 }
 0x1f7   :  { %v166_v38 = vrot.slane %v165_v37, 2 }
 0x1f9   :  { %v167_v39 = vadd.f32 %v166_v38, %v165_v37 }
 0x1fb   :  { %v168_v40 = vrot.slane %v167_v39, 1 }
 0x1fd   :  { %v169_v41 = vadd.f32 %v168_v40, %v167_v39 }
 0x1ff   :  { %206 = vpush %v169_v41 }
 0x230   :  { %s207_s17 = spop %206 }
 0x231   :  { %v171_v42 = vstv %s207_s17 }
 0x232   :  { %173 = vst.msk [vmem:[#allocation3] sm:$0x1] %vm172_vm3, %v171_v42 }
 0x233   :  { %229 = shalt.err (!%p226_p4)
}
 0x234   :  { %s230_s22 = scalar_lea.hbm %s295_s3, 16 }
 0x235   :  { %p231_p5 = scmp.ne.s32.totalorder %s295_s3, %s230_s22  ;;  %p234_p6 = scmp.lt.u32.totalorder %s230_s22, %s295_s3 }
 0x237   :  { %p236_p7 = pnand %p234_p6, %p231_p5 }
 0x239   :  { %239 = shalt.err (!%p236_p7)
}
 0x23a   :  { %183 = dma.vmem_to_hbm [thread:$0]  %s181_s16, 16, %s295_s3, [#allocation4]  }
 0x23b   :  { %240 = dma.done.wait [#allocation4], 16  }
 0x23c   :  { %241 = vsyncadd [#allocation4], 4294967280 }
 0x23d   :  { %187 = vsyncpa [#allocation4], 1 }

</bundles_post_ra>
